<compile_context>
chip_gen: v7x
topology: tpu7x:2x2x1
jax: 0.10.0
libtpu: 0.0.40
codegen_flags: <defaults>
</compile_context>

<pallas_src>
import functools

import jax
import jax.numpy as jnp
from jax.experimental import pallas as pl
from jax.experimental.pallas import tpu as pltpu

_LANE = 128
_SUBLANE = 8


def _round_up(v, m):
    return ((v + m - 1) // m) * m


def pna_kernel(x_ref, o_ref, s_ref, ssq_ref, mx_ref, mn_ref, *, K):
    # x_ref: (tn, tk, H) input tile ; o_ref: (tn, 5, H) output tile
    # s/ssq/mx/mn_ref: (tn, H) f32 running accumulators (persist across the K grid axis)
    k = pl.program_id(1)
    nk = pl.num_programs(1)
    tk = x_ref.shape[1]

    @pl.when(k == 0)
    def _init():
        s_ref[...] = jnp.zeros_like(s_ref)
        ssq_ref[...] = jnp.zeros_like(ssq_ref)
        mx_ref[...] = jnp.full_like(mx_ref, -jnp.inf)
        mn_ref[...] = jnp.full_like(mn_ref, jnp.inf)

    x = x_ref[...].astype(jnp.float32)  # (tn, tk, H); no-op cast for f32 inputs

    if K % tk != 0:
        # Only traced when the K grid has a ragged last block: mask out-of-range
        # neighbour rows so they cannot contaminate the statistics.
        kidx = k * tk + jax.lax.broadcasted_iota(jnp.int32, x.shape, dimension=1)
        valid = kidx < K
        x_sum = jnp.where(valid, x, 0.0)
        x_max = jnp.where(valid, x, -jnp.inf)
        x_min = jnp.where(valid, x, jnp.inf)
    else:
        x_sum = x_max = x_min = x

    s_ref[...] = s_ref[...] + jnp.sum(x_sum, axis=1)
    ssq_ref[...] = ssq_ref[...] + jnp.sum(x_sum * x_sum, axis=1)
    mx_ref[...] = jnp.maximum(mx_ref[...], jnp.max(x_max, axis=1))
    mn_ref[...] = jnp.minimum(mn_ref[...], jnp.min(x_min, axis=1))

    @pl.when(k == nk - 1)
    def _finalize():
        dt = o_ref.dtype
        s = s_ref[...]
        mean = s * (1.0 / K)
        if K > 1:
            # single-pass unbiased variance; clamp tiny negative cancellation noise
            var = jnp.maximum((ssq_ref[...] - s * mean) * (1.0 / (K - 1)), 0.0)
        else:
            var = jnp.full_like(s, jnp.nan)  # matches torch.var(ddof=1) for K == 1
        o_ref[:, 0, :] = s.astype(dt)
        o_ref[:, 1, :] = mean.astype(dt)
        o_ref[:, 2, :] = mx_ref[...].astype(dt)
        o_ref[:, 3, :] = mn_ref[...].astype(dt)
        o_ref[:, 4, :] = var.astype(dt)


def _vmem_budget_bytes(K, H, itemsize, tn, tk):
    """Approximate peak VMEM of one pipelined step, including layout padding and
    the in-kernel f32 temporaries (cast / square / masks)."""
    H_pad = _round_up(H, _LANE)
    tk_pad = _round_up(tk, _SUBLANE)
    in_blk = tn * tk_pad * H_pad * itemsize          # one input block (VMEM footprint)
    out_blk = tn * _SUBLANE * H_pad * itemsize       # (tn, 5, H): 5 sublanes pad to 8
    acc = 4 * _round_up(tn, _SUBLANE) * H_pad * 4    # 4 f32 accumulators
    tmp_factor = 2 if (K % tk == 0) else 5           # f32 temporaries in the kernel body
    tmp = tmp_factor * tn * tk_pad * H_pad * 4
    return 2 * in_blk + 2 * out_blk + acc + tmp      # x2 = double-buffered pipeline


def _choose_tiles(N, K, H, itemsize):
    H_pad = _round_up(H, _LANE)
    target = 4 << 20   # ~4 MiB VMEM per input block (good on v7x/v6e, fine on v5e)
    cap = 32 << 20     # total in-flight VMEM budget (buffers + scratch + temporaries)

    row_bytes = _round_up(K, _SUBLANE) * H_pad * itemsize  # one n row, all K, padded
    if row_bytes <= target:
        tk = K
    else:
        tk = min(K, max(32, (target // (H_pad * itemsize) // 32) * 32))

    per_n = _round_up(tk, _SUBLANE) * H_pad * itemsize
    tn = max(1, target // per_n)
    tn = min(tn, N)
    if N >= 4:
        # keep >= ~4 N-steps: software pipelining inside each core and work for
        # both TensorCores on v7x (the N axis is the "parallel" grid axis)
        tn = min(tn, pl.cdiv(N, 4))

    while tn > 1 and _vmem_budget_bytes(K, H, itemsize, tn, tk) > cap:
        tn = (tn + 1) // 2
    while tk != K and tk > 32 and _vmem_budget_bytes(K, H, itemsize, tn, tk) > cap:
        new_tk = max(32, ((tk // 2) // 32) * 32)
        if new_tk == tk:
            break
        tk = new_tk
    return tn, tk


def pna_ref(x):
    """Pure-JAX mirror of the PyTorch module (reduce dim=1, unbiased var)."""
    s = jnp.sum(x, axis=1)
    m = jnp.mean(x, axis=1)
    mx = jnp.max(x, axis=1)
    mn = jnp.min(x, axis=1)
    v = jnp.var(x, axis=1, ddof=1)
    return jnp.concatenate([s, m, mx, mn, v], axis=-1)


@functools.partial(jax.jit, static_argnames=("tn", "tk", "force_pallas"))
def pna(x, *, tn=None, tk=None, force_pallas=False):
    """PNA forward: x (N, K, H) -> (N, 5*H), reducing over dim=1."""
    N, K, H = x.shape
    itemsize = jnp.dtype(x.dtype).itemsize

    # Tiny inputs: fixed pallas_call overhead dominates; XLA fuses the 5 reductions.
    if not force_pallas and N * K * H * itemsize < (1 << 20):
        return pna_ref(x)

    auto_tn, auto_tk = _choose_tiles(N, K, H, itemsize)
    tn = auto_tn if tn is None else max(1, min(int(tn), N))
    tk = auto_tk if tk is None else max(1, min(int(tk), K))
    assert tk == K or tk % _SUBLANE == 0, "tk must equal K or be a multiple of 8"

    grid = (pl.cdiv(N, tn), pl.cdiv(K, tk))
    budget = _vmem_budget_bytes(K, H, itemsize, tn, tk)
    vmem_limit = int(min(max(budget * 3 // 2, 16 << 20), 48 << 20))

    out = pl.pallas_call(
        functools.partial(pna_kernel, K=K),
        out_shape=jax.ShapeDtypeStruct((N, 5, H), x.dtype),
        grid_spec=pltpu.PrefetchScalarGridSpec(
            num_scalar_prefetch=0,
            grid=grid,
            in_specs=[pl.BlockSpec((tn, tk, H), lambda i, k: (i, k, 0))],
            out_specs=pl.BlockSpec((tn, 5, H), lambda i, k: (i, 0, 0)),
            scratch_shapes=[pltpu.VMEM((tn, H), jnp.float32)] * 4,
        ),
        compiler_params=pltpu.CompilerParams(
            dimension_semantics=("parallel", "arbitrary"),
            vmem_limit_bytes=vmem_limit,
        ),
        cost_estimate=pl.CostEstimate(
            flops=5 * N * K * H,
            transcendentals=0,
            bytes_accessed=(N * K * H + 5 * N * H) * itemsize,
        ),
    )(x)

    # (N, 5, H) -> (N, 5*H) is a contiguous merge of the last two axes (free,
    # no data movement) and matches torch.cat([sum, mean, max, min, var], dim=-1).
    return out.reshape(N, 5 * H)


if __name__ == "__main__":
    key = jax.random.PRNGKey(0)
    k1, k2, k3 = jax.random.split(key, 3)

    # Case 1: nominal module shape, default tiling (single K block, multiple N blocks).
    N, K, H = 8, 8, 32
    x = jax.random.normal(k1, (N, K, H), dtype=jnp.float32)
    out = jax.block_until_ready(pna(x, force_pallas=True))
    ref = pna_ref(x)
    assert out.shape == (N, 5 * H), out.shape
    assert jnp.allclose(out, ref, atol=1e-5, rtol=1e-5), "mismatch vs reference (case 1)"

    # Case 2: ragged N and K tiles -> exercises the Pallas edge-block masking on N,
    # the in-kernel K mask (K % tk != 0), and the multi-step accumulator path.
    N2, K2, H2 = 6, 12, 24
    x2 = jax.random.normal(k2, (N2, K2, H2), dtype=jnp.float32)
    out2 = jax.block_until_ready(pna(x2, tn=4, tk=8, force_pallas=True))
    ref2 = pna_ref(x2)
    assert out2.shape == (N2, 5 * H2), out2.shape
    assert jnp.allclose(out2, ref2, atol=1e-5, rtol=1e-5), "mismatch vs reference (case 2)"

    # Case 3: bf16 input (f32 accumulation in-kernel, rounded back to bf16 on store).
    N3, K3, H3 = 16, 8, 32
    x3 = jax.random.normal(k3, (N3, K3, H3), dtype=jnp.bfloat16)
    out3 = jax.block_until_ready(pna(x3, force_pallas=True))
    ref3 = pna_ref(x3.astype(jnp.float32))
    assert out3.shape == (N3, 5 * H3), out3.shape
    assert jnp.allclose(out3.astype(jnp.float32), ref3, atol=1e-1, rtol=1e-1), \
        "mismatch vs reference (case 3, bf16)"

    # Case 4: small-input fast path (fused XLA fallback).
    out4 = jax.block_until_ready(pna(x))
    assert jnp.allclose(out4, ref, atol=1e-5, rtol=1e-5), "mismatch vs reference (case 4)"

    print("KERNEL_OK")
</pallas_src>

<mosaic_0001>
module attributes {stable_mosaic.version = 11 : i64} {
  func.func @pna_kernel(%arg0: i32, %arg1: i32, %arg2: memref<2x8x32xf32, #tpu.memory_space<vmem>>, %arg3: memref<2x5x32xf32, #tpu.memory_space<vmem>>, %arg4: memref<2x32xf32, #tpu.memory_space<vmem>>, %arg5: memref<2x32xf32, #tpu.memory_space<vmem>>, %arg6: memref<2x32xf32, #tpu.memory_space<vmem>>, %arg7: memref<2x32xf32, #tpu.memory_space<vmem>>) attributes {dimension_semantics = [#tpu.dimension_semantics<parallel>, #tpu.dimension_semantics<arbitrary>], iteration_bounds = array<i64: 4, 1>, scalar_prefetch = 0 : i64, scratch_operands = 4 : i64, tpu.core_type = #tpu.core_type<tc>, window_params = [{transform_indices = @transform_0, window_bounds = array<i64: 2, 8, 32>}, {transform_indices = @transform_1, window_bounds = array<i64: 2, 5, 32>}]} {
    %c0_i32 = arith.constant 0 : i32
    %0 = arith.cmpi eq, %arg1, %c0_i32 : i32
    %1 = arith.extui %0 : i1 to i32
    %c0_i32_0 = arith.constant 0 : i32
    %2 = arith.cmpi ne, %1, %c0_i32_0 : i32
    scf.if %2 {
      %cst_24 = arith.constant 0.000000e+00 : f32
      %24 = vector.broadcast %cst_24 : f32 to vector<2x32xf32>
      %c0_25 = arith.constant 0 : index
      %c0_26 = arith.constant 0 : index
      %25 = vector.load %arg4[%c0_25, %c0_26] : memref<2x32xf32, #tpu.memory_space<vmem>>, vector<2x32xf32>
      tpu.vector_store %arg4[%c0_25, %c0_26], %24 {strides = array<i32>} : memref<2x32xf32, #tpu.memory_space<vmem>>, vector<2x32xf32>,
      %cst_27 = arith.constant 0.000000e+00 : f32
      %26 = vector.broadcast %cst_27 : f32 to vector<2x32xf32>
      %c0_28 = arith.constant 0 : index
      %c0_29 = arith.constant 0 : index
      %27 = vector.load %arg5[%c0_28, %c0_29] : memref<2x32xf32, #tpu.memory_space<vmem>>, vector<2x32xf32>
      tpu.vector_store %arg5[%c0_28, %c0_29], %26 {strides = array<i32>} : memref<2x32xf32, #tpu.memory_space<vmem>>, vector<2x32xf32>,
      %cst_30 = arith.constant 0xFF800000 : f32
      %28 = vector.broadcast %cst_30 : f32 to vector<2x32xf32>
      %c0_31 = arith.constant 0 : index
      %c0_32 = arith.constant 0 : index
      %29 = vector.load %arg6[%c0_31, %c0_32] : memref<2x32xf32, #tpu.memory_space<vmem>>, vector<2x32xf32>
      tpu.vector_store %arg6[%c0_31, %c0_32], %28 {strides = array<i32>} : memref<2x32xf32, #tpu.memory_space<vmem>>, vector<2x32xf32>,
      %cst_33 = arith.constant 0x7F800000 : f32
      %30 = vector.broadcast %cst_33 : f32 to vector<2x32xf32>
      %c0_34 = arith.constant 0 : index
      %c0_35 = arith.constant 0 : index
      %31 = vector.load %arg7[%c0_34, %c0_35] : memref<2x32xf32, #tpu.memory_space<vmem>>, vector<2x32xf32>
      tpu.vector_store %arg7[%c0_34, %c0_35], %30 {strides = array<i32>} : memref<2x32xf32, #tpu.memory_space<vmem>>, vector<2x32xf32>,
    } else {
    }
    %c0 = arith.constant 0 : index
    %c0_1 = arith.constant 0 : index
    %c0_2 = arith.constant 0 : index
    %3 = vector.load %arg2[%c0, %c0_1, %c0_2] : memref<2x8x32xf32, #tpu.memory_space<vmem>>, vector<2x8x32xf32>
    %c0_3 = arith.constant 0 : index
    %c0_4 = arith.constant 0 : index
    %4 = vector.load %arg4[%c0_3, %c0_4] : memref<2x32xf32, #tpu.memory_space<vmem>>, vector<2x32xf32>
    %cst = arith.constant dense<0.000000e+00> : vector<2x32xf32>
    %5 = vector.multi_reduction <add>, %3, %cst [1] : vector<2x8x32xf32> to vector<2x32xf32>
    %6 = arith.addf %4, %5 : vector<2x32xf32>
    %c0_5 = arith.constant 0 : index
    %c0_6 = arith.constant 0 : index
    %7 = vector.load %arg4[%c0_5, %c0_6] : memref<2x32xf32, #tpu.memory_space<vmem>>, vector<2x32xf32>
    tpu.vector_store %arg4[%c0_5, %c0_6], %6 {strides = array<i32>} : memref<2x32xf32, #tpu.memory_space<vmem>>, vector<2x32xf32>,
    %c0_7 = arith.constant 0 : index
    %c0_8 = arith.constant 0 : index
    %8 = vector.load %arg5[%c0_7, %c0_8] : memref<2x32xf32, #tpu.memory_space<vmem>>, vector<2x32xf32>
    %9 = arith.mulf %3, %3 : vector<2x8x32xf32>
    %cst_9 = arith.constant dense<0.000000e+00> : vector<2x32xf32>
    %10 = vector.multi_reduction <add>, %9, %cst_9 [1] : vector<2x8x32xf32> to vector<2x32xf32>
    %11 = arith.addf %8, %10 : vector<2x32xf32>
    %c0_10 = arith.constant 0 : index
    %c0_11 = arith.constant 0 : index
    %12 = vector.load %arg5[%c0_10, %c0_11] : memref<2x32xf32, #tpu.memory_space<vmem>>, vector<2x32xf32>
    tpu.vector_store %arg5[%c0_10, %c0_11], %11 {strides = array<i32>} : memref<2x32xf32, #tpu.memory_space<vmem>>, vector<2x32xf32>,
    %c0_12 = arith.constant 0 : index
    %c0_13 = arith.constant 0 : index
    %13 = vector.load %arg6[%c0_12, %c0_13] : memref<2x32xf32, #tpu.memory_space<vmem>>, vector<2x32xf32>
    %cst_14 = arith.constant dense<0xFF800000> : vector<2x32xf32>
    %14 = vector.multi_reduction <maximumf>, %3, %cst_14 [1] : vector<2x8x32xf32> to vector<2x32xf32>
    %15 = arith.maximumf %13, %14 : vector<2x32xf32>
    %c0_15 = arith.constant 0 : index
    %c0_16 = arith.constant 0 : index
    %16 = vector.load %arg6[%c0_15, %c0_16] : memref<2x32xf32, #tpu.memory_space<vmem>>, vector<2x32xf32>
    tpu.vector_store %arg6[%c0_15, %c0_16], %15 {strides = array<i32>} : memref<2x32xf32, #tpu.memory_space<vmem>>, vector<2x32xf32>,
    %c0_17 = arith.constant 0 : index
    %c0_18 = arith.constant 0 : index
    %17 = vector.load %arg7[%c0_17, %c0_18] : memref<2x32xf32, #tpu.memory_space<vmem>>, vector<2x32xf32>
    %cst_19 = arith.constant dense<0x7F800000> : vector<2x32xf32>
    %18 = vector.multi_reduction <minimumf>, %3, %cst_19 [1] : vector<2x8x32xf32> to vector<2x32xf32>
    %19 = arith.minimumf %17, %18 : vector<2x32xf32>
    %c0_20 = arith.constant 0 : index
    %c0_21 = arith.constant 0 : index
    %20 = vector.load %arg7[%c0_20, %c0_21] : memref<2x32xf32, #tpu.memory_space<vmem>>, vector<2x32xf32>
    tpu.vector_store %arg7[%c0_20, %c0_21], %19 {strides = array<i32>} : memref<2x32xf32, #tpu.memory_space<vmem>>, vector<2x32xf32>,
    %c0_i32_22 = arith.constant 0 : i32
    %21 = arith.cmpi eq, %arg1, %c0_i32_22 : i32
    %22 = arith.extui %21 : i1 to i32
    %c0_i32_23 = arith.constant 0 : i32
    %23 = arith.cmpi ne, %22, %c0_i32_23 : i32
    scf.if %23 {
      %c0_24 = arith.constant 0 : index
      %c0_25 = arith.constant 0 : index
      %24 = vector.load %arg4[%c0_24, %c0_25] : memref<2x32xf32, #tpu.memory_space<vmem>>, vector<2x32xf32>
      %cst_26 = arith.constant 1.250000e-01 : f32
      %25 = vector.broadcast %cst_26 : f32 to vector<2x32xf32>
      %26 = arith.mulf %24, %25 : vector<2x32xf32>
      %c0_27 = arith.constant 0 : index
      %c0_28 = arith.constant 0 : index
      %27 = vector.load %arg5[%c0_27, %c0_28] : memref<2x32xf32, #tpu.memory_space<vmem>>, vector<2x32xf32>
      %28 = arith.mulf %24, %26 : vector<2x32xf32>
      %29 = arith.subf %27, %28 : vector<2x32xf32>
      %cst_29 = arith.constant 0.142857149 : f32
      %30 = vector.broadcast %cst_29 : f32 to vector<2x32xf32>
      %31 = arith.mulf %29, %30 : vector<2x32xf32>
      %cst_30 = arith.constant 0.000000e+00 : f32
      %32 = vector.broadcast %cst_30 : f32 to vector<2x32xf32>
      %33 = arith.maximumf %31, %32 : vector<2x32xf32>
      %c0_31 = arith.constant 0 : index
      %c0_32 = arith.constant 0 : index
      %c0_33 = arith.constant 0 : index
      %34 = vector.load %arg3[%c0_31, %c0_32, %c0_33] : memref<2x5x32xf32, #tpu.memory_space<vmem>>, vector<2x1x32xf32>
      %35 = vector.shape_cast %34 : vector<2x1x32xf32> to vector<2x32xf32>
      %36 = vector.shape_cast %24 : vector<2x32xf32> to vector<2x1x32xf32>
      tpu.vector_store %arg3[%c0_31, %c0_32, %c0_33], %36 {strides = array<i32>} : memref<2x5x32xf32, #tpu.memory_space<vmem>>, vector<2x1x32xf32>,
      %c0_34 = arith.constant 0 : index
      %c1 = arith.constant 1 : index
      %c0_35 = arith.constant 0 : index
      %37 = vector.load %arg3[%c0_34, %c1, %c0_35] : memref<2x5x32xf32, #tpu.memory_space<vmem>>, vector<2x1x32xf32>
      %38 = vector.shape_cast %37 : vector<2x1x32xf32> to vector<2x32xf32>
      %39 = vector.shape_cast %26 : vector<2x32xf32> to vector<2x1x32xf32>
      tpu.vector_store %arg3[%c0_34, %c1, %c0_35], %39 {strides = array<i32>} : memref<2x5x32xf32, #tpu.memory_space<vmem>>, vector<2x1x32xf32>,
      %c0_36 = arith.constant 0 : index
      %c0_37 = arith.constant 0 : index
      %40 = vector.load %arg6[%c0_36, %c0_37] : memref<2x32xf32, #tpu.memory_space<vmem>>, vector<2x32xf32>
      %c0_38 = arith.constant 0 : index
      %c2 = arith.constant 2 : index
      %c0_39 = arith.constant 0 : index
      %41 = vector.load %arg3[%c0_38, %c2, %c0_39] : memref<2x5x32xf32, #tpu.memory_space<vmem>>, vector<2x1x32xf32>
      %42 = vector.shape_cast %41 : vector<2x1x32xf32> to vector<2x32xf32>
      %43 = vector.shape_cast %40 : vector<2x32xf32> to vector<2x1x32xf32>
      tpu.vector_store %arg3[%c0_38, %c2, %c0_39], %43 {strides = array<i32>} : memref<2x5x32xf32, #tpu.memory_space<vmem>>, vector<2x1x32xf32>,
      %c0_40 = arith.constant 0 : index
      %c0_41 = arith.constant 0 : index
      %44 = vector.load %arg7[%c0_40, %c0_41] : memref<2x32xf32, #tpu.memory_space<vmem>>, vector<2x32xf32>
      %c0_42 = arith.constant 0 : index
      %c3 = arith.constant 3 : index
      %c0_43 = arith.constant 0 : index
      %45 = vector.load %arg3[%c0_42, %c3, %c0_43] : memref<2x5x32xf32, #tpu.memory_space<vmem>>, vector<2x1x32xf32>
      %46 = vector.shape_cast %45 : vector<2x1x32xf32> to vector<2x32xf32>
      %47 = vector.shape_cast %44 : vector<2x32xf32> to vector<2x1x32xf32>
      tpu.vector_store %arg3[%c0_42, %c3, %c0_43], %47 {strides = array<i32>} : memref<2x5x32xf32, #tpu.memory_space<vmem>>, vector<2x1x32xf32>,
      %c0_44 = arith.constant 0 : index
      %c4 = arith.constant 4 : index
      %c0_45 = arith.constant 0 : index
      %48 = vector.load %arg3[%c0_44, %c4, %c0_45] : memref<2x5x32xf32, #tpu.memory_space<vmem>>, vector<2x1x32xf32>
      %49 = vector.shape_cast %48 : vector<2x1x32xf32> to vector<2x32xf32>
      %50 = vector.shape_cast %33 : vector<2x32xf32> to vector<2x1x32xf32>
      tpu.vector_store %arg3[%c0_44, %c4, %c0_45], %50 {strides = array<i32>} : memref<2x5x32xf32, #tpu.memory_space<vmem>>, vector<2x1x32xf32>,
    } else {
    }
    return
  }
  func.func @transform_0(%arg0: i32, %arg1: i32) -> (i32, i32, i32) {
    %c0_i32 = arith.constant 0 : i32
    %c0_i32_0 = arith.constant 0 : i32
    return %arg0, %arg1, %c0_i32 : i32, i32, i32
  }
  func.func @transform_1(%arg0: i32, %arg1: i32) -> (i32, i32, i32) {
    %c0_i32 = arith.constant 0 : i32
    %c0_i32_0 = arith.constant 0 : i32
    %c0_i32_1 = arith.constant 0 : i32
    return %arg0, %c0_i32, %c0_i32_0 : i32, i32, i32
  }
}

</mosaic_0001>

<bundles_post_ra>
// kernel: pna.1
= control target key start
LH: loop header
LB: loop body
LE: loop exit
PB: predicated region body
PF: predicated region fallthrough
CT: control target
= control target key end

     0   :  { %6 = vsyncpa [#allocation7], 0  ;;  %s825_s0 = inlined_call_operand.hbm [shape: f32[8,8,32], index: 0, kind: input, shape index: {}]   ;;  %s826_s1 = inlined_call_operand.vmem [shape: f32[8,5,32], index: 1, kind: output, shape index: {}]  }
   0x1   :  { %8 = vsyncpa [#allocation7 + $0x1], 0  ;;  %s656_s6 = smov 0   ;;  %s658_s7 = smov 0  }
   0x2   :  { %s660_s8 = smov 0   ;;  %s662_s9 = smov 0  }
   0x3   :  { %s664_s10 = smov 0   ;;  %s666_s11 = smov 0  }
   0x4 LB: > { %s480_s12 = sadd.s32 4294967295, %s637_s11   ;;  %s26_s13 = sadd.s32 1, %s633_s10  ;;  %s637_s11 = sphi %s666_s11, %s14_s11   ;;  %s633_s10 = sphi %s664_s10, %s834_s10   ;;  %s629_s9 = sphi %s662_s9, %s833_s9   ;;  %s625_s8 = sphi %s660_s8, %s832_s8   ;;  %s621_s7 = sphi %s658_s7, %s831_s7   ;;  %s617_s6 = sphi %s656_s6, %s830_s6  }
   0x5   : > { %p28_p0 = scmp.ge.s32.totalorder %s26_s13, 4  ;;  %s35_s14 = sadd.s32 1, %s625_s8 }
   0x6   : > { %p42_p1 = scmp.ne.s32.totalorder %s625_s8, %s621_s7  ;;  %p43_p2 = scmp.eq.s32.totalorder %s637_s11, 0 }
   0x7   : > { %s836_s13 = smov (%p28_p0, %s26_s13), 0  ;;  %p48_p4 = scmp.ne.s32.totalorder %s621_s7, %s617_s6 }
   0x8   : > { %p692_p3 = por %p43_p2, %p42_p1  ;;  %s30_s16 = ssub.s32 %s633_s10, %s836_s13 }
   0x9   : > { %p49_p5 = scmp.eq.s32.totalorder %s480_s12, 0  ;;  %p33_p6 = scmp.eq.s32.totalorder %s30_s16, 0 }
   0xa   : > { %p502_p8 = scmp.lt.s32.totalorder %s637_s11, 4  ;;  %s98_s19 = sand.u32 1, %s625_s8  }
   0xb   : > { %p699_p7 = por %p49_p5, %p48_p4  ;;  %s495_s20 = sshll.u32 %s633_s10, 8 }
   0xc   : > { %s705_s18 = scalar_select %p33_p6, %s625_s8, %s35_s14  }
   0xd   : > { %s484_s21 = sshll.u32 %s98_s19, 4  ;;  %s712_s24 = scalar_lea.hbm %s825_s0, %s495_s20 }
   0xe   : > { %s102_s25 = scalar_lea.vmem [#allocation6], %s484_s21  ;;  %p716_p9 = pnand %p502_p8, %p692_p3 }
   0xf   : > { %s110_s26 = sshll.u32 %s102_s25, 4  ;;  %s722_s28 = scalar_lea.sflag [#allocation7], %s98_s19  ;;  %s720_s26 = int_to_ptr.vmem [resolvable:$true] %s110_s26 }
  0x10   : > { %s557_s29 = scalar_lea.hbm %s712_s24, 256  ;;  %p559_p11 = pneg %p716_p9 }
  0x11   : > { %p558_p10 = scmp.ne.s32.totalorder %s712_s24, %s557_s29  ;;  %s562_s3 = scalar_lea.hbm %s825_s0, 1024 }
  0x12   : > { %p563_p0 = scmp.lt.u32.totalorder %s712_s24, %s825_s0  ;;  %p564_p1 = scmp.lt.u32.totalorder %s562_s3, %s557_s29 }
  0x13   : > { %p560_p12 = pnand %p559_p11, %p558_p10  ;;  %p566_p3 = scmp.lt.u32.totalorder %s557_s29, %s712_s24 }
  0x14   : > { %p565_p2 = por %p564_p1, %p563_p0 }
  0x15   : > { %p561_p13 = pneg %p560_p12 }
  0x16   : > { %p567_p4 = por %p566_p3, %p565_p2 }
  0x18   : > { %p568_p5 = pnand %p567_p4, %p561_p13 }
  0x1a   : > { %571 = shalt.err (!%p568_p5)
}
  0x1b   : > { %s572_s6 = scalar_lea.vmem %s720_s26, 256  ;;  %s639_s12 = smov [#allocation6]  }
  0x1c   : > { %p573_p6 = scmp.ne.s32.totalorder %s720_s26, %s572_s6  ;;  %s577_s14 = sshll.u32 %s639_s12, 4  ;;  %s578_s14 = int_to_ptr.vmem [resolvable:$false] %s577_s14 }
  0x1d   : > { %s579_s15 = scalar_lea.vmem %s578_s14, 512  ;;  %p580_p12 = scmp.lt.s32.totalorder %s720_s26, %s578_s14 }
  0x1e   : > { %p575_p8 = pnand %p573_p6, %p559_p11  ;;  %p581_p0 = scmp.lt.s32.totalorder %s579_s15, %s572_s6 }
  0x20   : > { %p576_p10 = pneg %p575_p8  ;;  %p582_p1 = por %p581_p0, %p580_p12 }
  0x22   : > { %p583_p2 = pnand %p582_p1, %p576_p10 }
  0x24   : > { %586 = shalt.err (!%p583_p2)
}
  0x25   : > { %s640_s16 = smov 128   ;;  %s641_s19 = smov 8  }
  0x26   : > { %501 = dma.hbm_to_vmem [thread:$0]  (!%p716_p9), %s712_s24, 256, %s720_s26, %s722_s28, %s640_s16, %s640_s16, %s641_s19  }
  0x27   : > { %p487_p11 = scmp.ge.s32.totalorder %s637_s11, 1  ;;  %p118_p13 = scmp.lt.s32.totalorder %s637_s11, 5 }
  0x29   : > { %p119_p3 = pnand %p487_p11, %p118_p13 }
  0x2a   : > { %s124_s20 = sand.u32 (!%p119_p3), 1, %s621_s7  }
  0x2b   : > { %122 = sbr.rel (%p119_p3) target bundleno = 95 (0x5f), region = 24  ;;  %s488_s21 = sshll.u32 (!%p119_p3), %s124_s20, 4 }
  0x2c   : > { %s125_s22 = scalar_lea.sflag (!%p119_p3), [#allocation7], %s124_s20  ;;  %s128_s23 = scalar_lea.vmem (!%p119_p3), [#allocation6], %s488_s21 }
  0x32   : > { %612 = dma.done.wait (%p699_p7), %s125_s22, 256  }
  0x33   : > { %614 = vsyncadd (%p699_p7), %s125_s22, 4294967040  ;;  %vm158_vm0 = vcmask 254976   ;;  %v642_v0 = vmov 0.0   ;;  %v643_v1 = vmov -inf   ;;  %v644_v2 = vmov inf   ;;  %v163_v3 = vld [vmem:[%s128_s23] sm:$0xff] }
  0x34   : > { %159 = vst.msk [vmem:[#allocation2] sm:$0x3] %vm158_vm0, %v642_v0  ;;  %160 = vst.msk [vmem:[#allocation3] sm:$0x3] %vm158_vm0, %v642_v0  ;;  %vm166_vm1 = vcmask 261120   ;;  %v164_v4 = vld [vmem:[%s128_s23 + $0x8] sm:$0xff]  ;;  %v268_v7 = vlaneseq  ;;  %v190_v10 = vmul.f32 %v163_v3, %v163_v3 }
  0x35   : > { %161 = vst.msk [vmem:[#allocation4] sm:$0x3] %vm158_vm0, %v643_v1  ;;  %162 = vst.msk [vmem:[#allocation5] sm:$0x3] %vm158_vm0, %v644_v2  ;;  %v645_v5 = vmov 1966171168   ;;  %v191_v11 = vmul.f32 %v164_v4, %v164_v4 }
  0x36   : > { %v761_v6 = vunpack.c.l.s4 %v645_v5  ;;  %v167_v8 = vsel %vm166_vm1, %v163_v3, 0.0  ;;  %v174_v9 = vsel %vm166_vm1, %v164_v4, 0.0  ;;  %v213_v14 = vsel %vm166_vm1, %v163_v3, -inf  ;;  %s489_s17 = sshll.u32 %s629_s9, 1 }
  0x37   : > { %v168_v12 = vrot.slane %v167_v8, 4  ;;  %v175_v13 = vrot.slane %v174_v9, 4  ;;  %v220_v15 = vsel %vm166_vm1, %v164_v4, -inf  ;;  %vm183_vm2 = vcmask 1041409   ;;  %p149_p7 = scmp.lt.s32.totalorder %s489_s17, 7 }
  0x38   : > { %v192_v16 = vsel %vm166_vm1, %v190_v10, 0.0  ;;  %v199_v17 = vsel %vm166_vm1, %v191_v11, 0.0  ;;  %v214_v18 = vrot.slane %v213_v14, 4  ;;  %v221_v19 = vrot.slane %v220_v15, 4 }
  0x39   : > { %v169_v20 = vadd.f32 %v168_v12, %v167_v8  ;;  %v176_v21 = vadd.f32 %v175_v13, %v174_v9  ;;  %v193_v22 = vrot.slane %v192_v16, 4  ;;  %v200_v23 = vrot.slane %v199_v17, 4  ;;  %s838_s17 = smov (!%p149_p7, %s489_s17), 7 }
  0x3a   : > { %v215_v24 = vmax.f32 %v213_v14, %v214_v18  ;;  %v222_v25 = vmax.f32 %v220_v15, %v221_v19  ;;  %v234_v26 = vsel %vm166_vm1, %v163_v3, inf  ;;  %v241_v27 = vsel %vm166_vm1, %v164_v4, inf  ;;  %s490_s9 = sshll.u32 %s838_s17, 3 }
  0x3b   : > { %v170_v28 = vrot.slane %v169_v20, 2  ;;  %v177_v29 = vrot.slane %v176_v21, 2  ;;  %v194_v30 = vadd.f32 %v193_v22, %v192_v16  ;;  %v201_v31 = vadd.f32 %v200_v23, %v199_v17  ;;  %v165_v52 = vld [vmem:[#allocation2] sm:$0x3]  ;;  %v189_v63 = vld [vmem:[#allocation3] sm:$0x3]  ;;  %s785_s26 = scalar_lea.vmem %s826_s1, %s490_s9 }
  0x3c   : > { %v216_v32 = vrot.slane %v215_v24, 2  ;;  %v223_v33 = vrot.slane %v222_v25, 2  ;;  %v235_v34 = vrot.slane %v234_v26, 4  ;;  %v242_v35 = vrot.slane %v241_v27, 4  ;;  %v212_v57 = vld [vmem:[#allocation4] sm:$0x3] }
  0x3d   : > { %v171_v36 = vadd.f32 %v170_v28, %v169_v20  ;;  %v178_v37 = vadd.f32 %v177_v29, %v176_v21  ;;  %v195_v38 = vrot.slane %v194_v30, 2  ;;  %v202_v39 = vrot.slane %v201_v31, 2  ;;  %v233_v12 = vld [vmem:[#allocation5] sm:$0x3] }
  0x3e   : > { %v217_v40 = vmax.f32 %v215_v24, %v216_v32  ;;  %v224_v41 = vmax.f32 %v222_v25, %v223_v33  ;;  %v236_v42 = vmin.f32 %v234_v26, %v235_v34  ;;  %v243_v43 = vmin.f32 %v241_v27, %v242_v35 }
  0x3f   : > { %v172_v44 = vrot.slane %v171_v36, 1  ;;  %v179_v45 = vrot.slane %v178_v37, 1  ;;  %v196_v46 = vadd.f32 %v195_v38, %v194_v30  ;;  %v203_v47 = vadd.f32 %v202_v39, %v201_v31 }
  0x40   : > { %v218_v48 = vrot.slane %v217_v40, 1  ;;  %v225_v49 = vrot.slane %v224_v41, 1  ;;  %v237_v50 = vrot.slane %v236_v42, 2  ;;  %v244_v51 = vrot.slane %v243_v43, 2 }
  0x41   : > { %v173_v53 = vadd.f32 %v172_v44, %v171_v36  ;;  %v180_v54 = vadd.f32 %v179_v45, %v178_v37  ;;  %v197_v55 = vrot.slane %v196_v46, 1  ;;  %v204_v56 = vrot.slane %v203_v47, 1 }
  0x42   : > { %v219_v58 = vmax.f32 %v217_v40, %v218_v48  ;;  %v226_v59 = vmax.f32 %v224_v41, %v225_v49  ;;  %v238_v60 = vmin.f32 %v236_v42, %v237_v50  ;;  %v245_v61 = vmin.f32 %v243_v43, %v244_v51 }
  0x43   : > { %v184_v62 = vsel %vm183_vm2, %v180_v54, %v173_v53  ;;  %v198_v0 = vadd.f32 %v197_v55, %v196_v46  ;;  %v205_v1 = vadd.f32 %v204_v56, %v203_v47  ;;  %v269_v10 = vshrl.u32 %v268_v7, 7 }
  0x44   : > { %v186_v2 = vadd.f32 %v184_v62, %v165_v52  ;;  %v229_v3 = vsel %vm183_vm2, %v226_v59, %v219_v58  ;;  %v239_v4 = vrot.slane %v238_v60, 1  ;;  %v246_v5 = vrot.slane %v245_v61, 1 }
  0x45   : > { %v208_v8 = vsel %vm183_vm2, %v205_v1, %v198_v0  ;;  %v231_v9 = vmax.f32 %v212_v57, %v229_v3  ;;  %v267_v15 = vunpack.c.0.s8 %v761_v6  ;;  %vm289_vm3 = vcmask 253952  }
  0x46   : > { %188 = vst.msk [vmem:[#allocation2] sm:$0x3] %vm158_vm0, %v186_v2  ;;  %v210_v11 = vadd.f32 %v208_v8, %v189_v63  ;;  %v240_v13 = vmin.f32 %v238_v60, %v239_v4  ;;  %v247_v14 = vmin.f32 %v245_v61, %v246_v5 }
  0x47   : > { %232 = vst.msk [vmem:[#allocation4] sm:$0x3] %vm158_vm0, %v231_v9  ;;  %v270_v18 = vsub.s32 %v267_v15, %v269_v10 }
  0x48   : > { %211 = vst.msk [vmem:[#allocation3] sm:$0x3] %vm158_vm0, %v210_v11  ;;  %v250_v16 = vsel %vm183_vm2, %v247_v14, %v240_v13 }
  0x49   : > { %v252_v17 = vmin.f32 %v233_v12, %v250_v16 }
  0x4b   : > { %253 = vst.msk [vmem:[#allocation5] sm:$0x3] %vm158_vm0, %v252_v17 }
  0x4d   : > { %v257_v7 = vld [vmem:[#allocation2] sm:$0x3] }
  0x4e   : > { %v271_v19 = vrot.slane %v257_v7, %v270_v18  ;;  %v258_v20 = vmul.f32 0.125, %v257_v7  ;;  %v491_v21 = vld.sshfl [vmem:[#allocation4] sm:$0x11 pattern:$0x75316420] }
  0x4f   : > { %v328_v6 = vcombine.high %v491_v21, %v491_v21  ;;  %v335_v22 = vrot.slane %v491_v21, %v270_v18  ;;  %v259_v23 = vld [vmem:[#allocation3] sm:$0x3] }
  0x50   : > { %v272_v24 = vcombine.high %v271_v19, %v271_v19  ;;  %v279_v25 = vrot.slane %v271_v19, %v270_v18  ;;  %v260_v26 = vmul.f32 %v258_v20, %v257_v7  ;;  %v299_v27 = vrot.slane %v258_v20, %v270_v18 }
  0x51   : > { %v342_v28 = vrot.slane %v328_v6, %v270_v18  ;;  %345 = vst.msk [vmem:[%s785_s26 + $0x2] sm:$0x1] %vm289_vm3, %v335_v22 }
  0x52   : > { %290 = vst.msk [vmem:[%s785_s26] sm:$0x1] %vm289_vm3, %v279_v25  ;;  %v286_v29 = vrot.slane %v272_v24, %v270_v18  ;;  %v300_v30 = vcombine.high %v299_v27, %v299_v27  ;;  %v307_v31 = vrot.slane %v299_v27, %v270_v18  ;;  %v492_v32 = vld.sshfl [vmem:[#allocation5] sm:$0x11 pattern:$0x75316420]  ;;  %v261_v33 = vsub.f32 %v259_v23, %v260_v26 }
  0x53   : > { %346 = vst.msk [vmem:[%s785_s26 + $0xa] sm:$0x1] %vm289_vm3, %v342_v28  ;;  %v356_v34 = vcombine.high %v492_v32, %v492_v32  ;;  %v363_v35 = vrot.slane %v492_v32, %v270_v18 }
  0x54   : > { %291 = vst.msk [vmem:[%s785_s26 + $0x8] sm:$0x1] %vm289_vm3, %v286_v29  ;;  %317 = vst.msk [vmem:[%s785_s26 + $0x1] sm:$0x1] %vm289_vm3, %v307_v31  ;;  %v314_v36 = vrot.slane %v300_v30, %v270_v18  ;;  %v262_v37 = vmul.f32 0.14285715, %v261_v33 }
  0x55   : > { %v370_v38 = vrot.slane %v356_v34, %v270_v18  ;;  %373 = vst.msk [vmem:[%s785_s26 + $0x3] sm:$0x1] %vm289_vm3, %v363_v35 }
  0x56   : > { %318 = vst.msk [vmem:[%s785_s26 + $0x9] sm:$0x1] %vm289_vm3, %v314_v36  ;;  %v263_v39 = vmax.f32 %v262_v37, 0.0 }
  0x57   : > { %374 = vst.msk [vmem:[%s785_s26 + $0xb] sm:$0x1] %vm289_vm3, %v370_v38 }
  0x58   : > { %v382_v40 = vrot.slane %v263_v39, %v270_v18 }
  0x5a   : > { %v383_v41 = vcombine.high %v382_v40, %v382_v40  ;;  %v390_v42 = vrot.slane %v382_v40, %v270_v18 }
  0x5c   : > { %400 = vst.msk [vmem:[%s785_s26 + $0x4] sm:$0x1] %vm289_vm3, %v390_v42  ;;  %v397_v43 = vrot.slane %v383_v41, %v270_v18 }
  0x5e   : > { %401 = vst.msk [vmem:[%s785_s26 + $0xc] sm:$0x1] %vm289_vm3, %v397_v43 }
  0x5f PF: > { %s14_s11 = sadd.s32 1, %s637_s11   ;;  %s830_s6 = smov %s621_s7 }
  0x60   : > { %p11_p9 = scmp.ge.s32.totalorder %s14_s11, 6   ;;  %s831_s7 = smov %s625_s8 }
  0x61   : > { %s832_s8 = smov %s705_s18  ;;  %s833_s9 = smov %s633_s10 }
  0x62   : > { %s834_s10 = smov %s836_s13  ;;  %13 = sbr.rel (!%p11_p9) target bundleno = 4 (0x4), region = 72 }
  0x69   :  { %424 = vsyncpa [#allocation7], 1 }
  0x6a   :  { %426 = vsyncpa [#allocation7 + $0x1], 1 }

</bundles_post_ra>
